<compile_context>
chip_gen: v5e
topology: v5e:2x2
jax: 0.10.0
libtpu: 0.0.40
codegen_flags: <defaults>
</compile_context>

<pallas_src>
import jax
import jax.numpy as jnp
from jax.experimental import pallas as pl
from jax.experimental.pallas import tpu as pltpu


def _droppath_kernel(scale_ref, fetch_ref, x_ref, o_ref):
    del fetch_ref  # only used by x's index_map (dropped-sample DMA skip)
    b = pl.program_id(1)
    s = scale_ref[b].astype(o_ref.dtype)  # f32 scale -> x.dtype, one cast/step
    o_ref[...] = x_ref[...] * s


def _droppath_residual_kernel(scale_ref, fetch_ref, x_ref, res_ref, o_ref):
    del fetch_ref
    b = pl.program_id(1)
    s = scale_ref[b].astype(o_ref.dtype)
    o_ref[...] = res_ref[...] + x_ref[...] * s


def _vmem_capacity_bytes():
    """Best-effort VMEM capacity query; conservative 64 MiB (v7x) fallback."""
    try:
        info = pltpu.get_tpu_info()
        for attr in ("vmem_capacity_bytes", "vmem_bytes", "vmem_size_bytes"):
            v = getattr(info, attr, None)
            if v:
                return int(v)
    except Exception:
        pass
    return 64 * 1024 * 1024


def _pick_row_tile(num_rows, row_bytes, target_bytes, sublane):
    """Row tile: full extent if it fits the byte budget, else the largest
    multiple of `sublane` that does.  The grid uses cdiv, so the tile does not
    need to divide num_rows (Pallas masks the edge block)."""
    if num_rows * row_bytes <= target_bytes:
        return num_rows
    max_rows = max(sublane, target_bytes // row_bytes)
    tile = max(sublane, (max_rows // sublane) * sublane)
    return min(num_rows, tile)


def drop_path(x, *, drop_prob=0.0, training=True, rng_key=None, residual=None):
    """DropPath forward. x: (B, ...). Optionally fuses out = residual + drop_path(x)."""
    if drop_prob == 0.0 or not training:
        return x if residual is None else x + residual
    if rng_key is None:
        raise ValueError("drop_path: rng_key is required when training with drop_prob > 0")

    keep_prob = 1.0 - float(drop_prob)
    B = int(x.shape[0])
    F = 1
    for d in x.shape[1:]:
        F *= int(d)

    # Per-sample Bernoulli(keep_prob) mask, same construction as the PyTorch
    # module: floor(keep_prob + U[0,1)).  Precompute the f32 scale (0 or
    # 1/keep_prob) and the "most recent kept sample" remap vector; both are
    # tiny and go to SMEM via scalar prefetch.
    u = jax.random.uniform(rng_key, (B,), dtype=jnp.float32)
    mask_f = jnp.floor(keep_prob + u)                                   # 0.0 / 1.0
    scale = (mask_f * (1.0 / keep_prob)).astype(jnp.float32)
    idx = jnp.arange(B, dtype=jnp.int32)
    fetch = jnp.maximum(jax.lax.cummax(jnp.where(mask_f > 0, idx, -1)), 0)
    fetch = fetch.astype(jnp.int32)

    # Lane-dense layout: flatten non-batch dims and pad to a multiple of 128 so
    # every block is (tR, 128) and every store is a full-width vst.
    itemsize = jnp.dtype(x.dtype).itemsize
    C = 128
    Fp = ((F + C - 1) // C) * C
    R = Fp // C

    def to_blocked(a):
        a = a.reshape(B, F)
        if Fp != F:
            a = jnp.pad(a, ((0, 0), (0, Fp - F)))
        return a.reshape(B, R, C)

    xv = to_blocked(x)

    # Generation-aware block size + derived VMEM limit.
    vmem_cap = _vmem_capacity_bytes()
    if vmem_cap <= 64 * 1024 * 1024:          # v7x-class: 64 MiB VMEM per TC
        target_block_bytes = 4 * 1024 * 1024
        vmem_clamp = 56 * 1024 * 1024
    else:                                      # v5e / v6e: 128 MiB VMEM
        target_block_bytes = 8 * 1024 * 1024
        vmem_clamp = 96 * 1024 * 1024

    sublane = max(8, (8 * 4) // itemsize)      # 8 f32 / 16 bf16 / 32 int8
    tR = _pick_row_tile(R, C * itemsize, target_block_bytes, sublane)
    num_r_tiles = pl.cdiv(R, tR)

    fused = residual is not None
    kernel = _droppath_residual_kernel if fused else _droppath_kernel

    block = (1, tR, C)
    # Dropped samples reuse the block index of the most recent kept sample
    # (batch is the innermost grid axis) -> their input DMA is deduped away.
    x_idx = lambda r, b, scale_ref, fetch_ref: (fetch_ref[b], r, 0)
    io_idx = lambda r, b, scale_ref, fetch_ref: (b, r, 0)

    in_specs = [pl.BlockSpec(block, x_idx)]
    operands = [scale, fetch, xv]
    if fused:
        in_specs.append(pl.BlockSpec(block, io_idx))
        operands.append(to_blocked(residual))

    num_streams = 3 if fused else 2            # streamed arrays, each double-buffered
    block_bytes = tR * C * itemsize
    vmem_needed = num_streams * 2 * block_bytes + (2 << 20)   # + slack
    vmem_limit = int(min(vmem_clamp, max(32 * 1024 * 1024, vmem_needed)))

    out = pl.pallas_call(
        kernel,
        out_shape=jax.ShapeDtypeStruct((B, R, C), x.dtype),
        grid_spec=pltpu.PrefetchScalarGridSpec(
            num_scalar_prefetch=2,             # scale (f32), fetch (int32) -> SMEM
            grid=(num_r_tiles, B),             # batch innermost: enables DMA skip
            in_specs=in_specs,
            out_specs=pl.BlockSpec(block, io_idx),
        ),
        compiler_params=pltpu.CompilerParams(
            # Row tiles shard across TensorCores (megacore); the batch axis
            # stays in-order per core so the dropped-sample dedup holds.
            dimension_semantics=("parallel", "arbitrary"),
            vmem_limit_bytes=vmem_limit,
        ),
    )(*operands)

    out = out.reshape(B, Fp)
    if Fp != F:
        out = out[:, :F]
    return out.reshape(x.shape)


if __name__ == "__main__":
    key = jax.random.PRNGKey(0)
    kx, kr, kd = jax.random.split(key, 3)

    B, N, D = 2, 8, 32
    x = jax.random.normal(kx, (B, N, D), dtype=jnp.float32)

    drop_prob = 0.25
    keep_prob = 1.0 - drop_prob

    # Training mode, drop_prob > 0: runs the Pallas kernel.
    y = jax.block_until_ready(drop_path(x, drop_prob=drop_prob, training=True, rng_key=kd))
    assert y.shape == x.shape and y.dtype == x.dtype

    # Sanity: each sample is either all-zero or x / keep_prob for that sample.
    for b in range(B):
        row = y[b]
        ok_kept = bool(jnp.allclose(row, x[b] / keep_prob, atol=1e-5))
        ok_dropped = bool(jnp.allclose(row, 0.0))
        assert ok_kept or ok_dropped, "per-sample mask semantics violated"

    # Fused residual path uses the same rng_key => same mask => res + y.
    res = jax.random.normal(kr, (B, N, D), dtype=jnp.float32)
    y_fused = jax.block_until_ready(
        drop_path(x, drop_prob=drop_prob, training=True, rng_key=kd, residual=res)
    )
    assert bool(jnp.allclose(y_fused, res + y, atol=1e-5))

    # Non-128 feature width, bf16, more samples + higher drop rate: exercises
    # the feature-dim padding path and the dropped-sample fetch remap.
    x2 = jax.random.normal(kx, (4, 5, 7), dtype=jnp.bfloat16)
    y2 = jax.block_until_ready(drop_path(x2, drop_prob=0.5, training=True, rng_key=kd))
    assert y2.shape == x2.shape and y2.dtype == x2.dtype
    for b in range(4):
        row = jnp.asarray(y2[b], jnp.float32)
        ref_kept = jnp.asarray(x2[b], jnp.float32) / 0.5
        assert bool(jnp.allclose(row, ref_kept, atol=3e-2)) or bool(jnp.allclose(row, 0.0))

    # Eval mode / drop_prob == 0: identity path.
    y_eval = jax.block_until_ready(drop_path(x, drop_prob=drop_prob, training=False))
    assert bool(jnp.allclose(y_eval, x))

    print("KERNEL_OK")
</pallas_src>

<mosaic_0001>
module attributes {stable_mosaic.version = 11 : i64} {
  func.func @_droppath_kernel(%arg0: i32, %arg1: i32, %arg2: memref<2xf32, #tpu.memory_space<smem>>, %arg3: memref<2xi32, #tpu.memory_space<smem>>, %arg4: memref<1x2x128xf32, #tpu.memory_space<vmem>>, %arg5: memref<1x2x128xf32, #tpu.memory_space<vmem>>) attributes {dimension_semantics = [#tpu.dimension_semantics<parallel>, #tpu.dimension_semantics<arbitrary>], iteration_bounds = array<i64: 1, 2>, scalar_prefetch = 2 : i64, scratch_operands = 0 : i64, tpu.core_type = #tpu.core_type<tc>, window_params = [{transform_indices = @transform_0, window_bounds = array<i64: 1, 2, 128>}, {transform_indices = @transform_1, window_bounds = array<i64: 1, 2, 128>}]} {
    %0 = arith.index_cast %arg1 : i32 to index
    %1 = memref.load %arg2[%0] : memref<2xf32, #tpu.memory_space<smem>>
    %c0 = arith.constant 0 : index
    %c0_0 = arith.constant 0 : index
    %c0_1 = arith.constant 0 : index
    %2 = vector.load %arg4[%c0, %c0_0, %c0_1] : memref<1x2x128xf32, #tpu.memory_space<vmem>>, vector<1x2x128xf32>
    %3 = vector.broadcast %1 : f32 to vector<1x2x128xf32>
    %4 = arith.mulf %2, %3 : vector<1x2x128xf32>
    %c0_2 = arith.constant 0 : index
    %c0_3 = arith.constant 0 : index
    %c0_4 = arith.constant 0 : index
    %5 = vector.load %arg5[%c0_2, %c0_3, %c0_4] : memref<1x2x128xf32, #tpu.memory_space<vmem>>, vector<1x2x128xf32>
    tpu.vector_store %arg5[%c0_2, %c0_3, %c0_4], %4 {strides = array<i32>} : memref<1x2x128xf32, #tpu.memory_space<vmem>>, vector<1x2x128xf32>,
    return
  }
  func.func @transform_0(%arg0: i32, %arg1: i32, %arg2: memref<2xf32, #tpu.memory_space<smem>>, %arg3: memref<2xi32, #tpu.memory_space<smem>>) -> (i32, i32, i32) {
    %0 = arith.index_cast %arg1 : i32 to index
    %1 = memref.load %arg3[%0] : memref<2xi32, #tpu.memory_space<smem>>
    %c0_i32 = arith.constant 0 : i32
    %c0_i32_0 = arith.constant 0 : i32
    return %1, %arg0, %c0_i32 : i32, i32, i32
  }
  func.func @transform_1(%arg0: i32, %arg1: i32, %arg2: memref<2xf32, #tpu.memory_space<smem>>, %arg3: memref<2xi32, #tpu.memory_space<smem>>) -> (i32, i32, i32) {
    %c0_i32 = arith.constant 0 : i32
    %c0_i32_0 = arith.constant 0 : i32
    return %arg1, %arg0, %c0_i32 : i32, i32, i32
  }
}

</mosaic_0001>

<bundles_post_ra>
// kernel: tpu_custom_call.1
= control target key start
LH: loop header
LB: loop body
LE: loop exit
PB: predicated region body
PF: predicated region fallthrough
CT: control target
= control target key end

     0   :  { %s541_s18 = smov [#allocation3]   ;;  %s542_s19 = smov [#allocation4]   ;;  %s741_s0 = inlined_call_operand.hbm [shape: f32[2], index: 0, kind: input, shape index: {}]   ;;  %s742_s2 = inlined_call_operand.hbm [shape: f32[2,2,128], index: 2, kind: input, shape index: {}]   ;;  %s743_s3 = inlined_call_operand.hbm [shape: f32[2,2,128], index: 3, kind: output, shape index: {}]   ;;  %s744_s1 = inlined_call_operand.hbm [shape: s32[2], index: 1, kind: input, shape index: {}]  }
   0x1   :  { %s9_s14 = sshll.u32 %s741_s0, 4  ;;  %s14_s17 = sshll.u32 %s744_s1, 4  ;;  %s10_s14 = int_to_ptr.hbm [resolvable:$true] %s9_s14  ;;  %s15_s17 = int_to_ptr.hbm [resolvable:$true] %s14_s17 }
   0x2   :  { %12 = dma.hbm_to_smem %s10_s14, 16, %s541_s18, [#allocation2] }
   0x3   :  { %17 = dma.hbm_to_smem %s15_s17, 16, %s542_s19, [#allocation2] }
   0x4   :  { %495 = dma.done.wait [#allocation2], 32 }
   0x5   :  { %496 = vsyncadd [#allocation2], 4294967264 }
   0x6   :  { %20 = sfence }
   0x7   :  { %21 = vsyncpa [#allocation6], 0 }
   0x8   :  { %23 = vsyncpa [#allocation6 + $0x1], 0 }
   0x9   :  { %24 = vsyncpa [#allocation7], 0 }
   0xa   :  { %26 = vsyncpa [#allocation7 + $0x1], 0  ;;  %s569_s20 = smov 0   ;;  %s571_s0 = smov 0  }
   0xb   :  { %s573_s21 = smov 0   ;;  %s575_s1 = smov 0  }
   0xc   :  { %s577_s22 = smov 0   ;;  %s579_s23 = smov 0  }
   0xd   :  { %s581_s24 = smov 0   ;;  %s583_s25 = smov 0  }
   0xe   :  { %s585_s26 = smov 0  }
   0xf LB: > { %747 = sst [smem:[#allocation14_spill]] %s535_s25  ;;  %s272_s27 = sadd.s32 4294967295, %s539_s26   ;;  %s539_s26 = sphi %s585_s26, %s32_s26   ;;  %s535_s25 = sphi %s583_s25, %s756_s25   ;;  %s531_s24 = sphi %s581_s24, %s755_s24   ;;  %s527_s23 = sphi %s579_s23, %s762_s23   ;;  %s523_s22 = sphi %s577_s22, %s761_s22   ;;  %s519_s1 = sphi %s575_s1, %s760_s1   ;;  %s515_s21 = sphi %s573_s21, %s759_s21   ;;  %s511_s0 = sphi %s571_s0, %s758_s0   ;;  %s507_s20 = sphi %s569_s20, %s757_s20  }
  0x10   : > { %s273_s28 = sadd.s32 4294967294, %s539_s26   ;;  %s41_s29 = sadd.s32 1, %s535_s25 }
  0x11   : > { %s48_s30 = sld [smem:[#allocation4 + %s535_s25]]  ;;  %p42_p0 = scmp.ge.s32.totalorder %s41_s29, 2 }
  0x12   : > { %s55_s4 = sadd.s32 1, %s527_s23  ;;  %p62_p1 = scmp.ne.s32.totalorder %s527_s23, %s523_s22 }
  0x13   : > { %p63_p2 = scmp.eq.s32.totalorder %s539_s26, 0  ;;  %s764_s29 = smov (%p42_p0, %s41_s29), 0 }
  0x14   : > { %748 = sst [smem:[#allocation15_spill]] %s764_s29  ;;  %p68_p4 = scmp.ne.s32.totalorder %s523_s22, %s519_s1 }
  0x15   : > { %p622_p3 = por %p63_p2, %p62_p1  ;;  %s49_s6 = sld [smem:[#allocation4 + %s764_s29]] }
  0x16   : > { %p69_p5 = scmp.eq.s32.totalorder %s272_s27, 0  ;;  %s78_s7 = ssub.s32 %s535_s25, %s764_s29 }
  0x17   : > { %s83_s8 = sadd.s32 1, %s515_s21  ;;  %p81_p7 = scmp.eq.s32.totalorder %s78_s7, 0 }
  0x18   : > { %p631_p6 = por %p69_p5, %p68_p4  ;;  %p93_p8 = scmp.ne.s32.totalorder %s515_s21, %s511_s0 }
  0x19   : > { %p94_p9 = scmp.eq.s32.totalorder %s272_s27, 1  ;;  %p99_p11 = scmp.ne.s32.totalorder %s511_s0, %s507_s20 }
  0x1a   : > { %s638_s10 = scalar_select %p81_p7, %s515_s21, %s83_s8  }
  0x1b   : > { %p640_p10 = por %p94_p9, %p93_p8  ;;  %s50_s12 = ssub.s32 %s48_s30, %s49_s6 }
  0x1c   : > { %p100_p12 = scmp.eq.s32.totalorder %s273_s28, 1  ;;  %p53_p13 = scmp.eq.s32.totalorder %s50_s12, 0 }
  0x1d   : > { %p275_p0 = scmp.ge.s32.totalorder %s539_s26, 2  ;;  %p301_p2 = scmp.lt.s32.totalorder %s539_s26, 2 }
  0x1e   : > { %p647_p1 = por %p100_p12, %p99_p11  ;;  %s120_s15 = sand.u32 1, %s527_s23  }
  0x1f   : > { %s653_s14 = scalar_select %p53_p13, %s527_s23, %s55_s4  }
  0x20   : > { %p658_p4 = pnand %p301_p2, %p622_p3  ;;  %s276_s17 = sshll.u32 %s120_s15, 1 }
  0x21   : > { %s285_s18 = scalar_select %p622_p3, [#allocation4], [#allocation9] }
  0x22   : > { %s286_s19 = scalar_select %p622_p3, %s535_s25, 0 }
  0x23   : > { %s766_s18 = smov (!%p301_p2, %s285_s18), [#allocation10]  ;;  %p278_p5 = scmp.ge.s32.totalorder %s539_s26, 1 }
  0x24   : > { %s768_s19 = smov (!%p301_p2, %s286_s19), 0  ;;  %p139_p7 = scmp.lt.s32.totalorder %s539_s26, 3 }
  0x25   : > { %s125_s1 = sld [smem:[%s766_s18 + %s768_s19]]  ;;  %s124_s28 = scalar_lea.vmem [#allocation5], %s276_s17 }
  0x26   : > { %p669_p8 = pnand %p278_p5, %p139_p7  ;;  %s134_s30 = sshll.u32 %s124_s28, 4  ;;  %s135_s30 = int_to_ptr.vmem [resolvable:$true] %s134_s30 }
  0x27   : > { %s121_s12 = scalar_lea.sflag [#allocation6], %s120_s15  ;;  %p405_p9 = pneg %p658_p4 }
  0x28   : > { %s408_s19 = scalar_lea.hbm %s742_s2, 4 }
  0x2b   : > { %s277_s4 = sshll.u32 %s125_s1, 1 }
  0x2c   : > { %s130_s8 = scalar_lea.hbm %s742_s2, %s277_s4 }
  0x2d   : > { %s132_s5 = sshll.u32 %s130_s8, 4  ;;  %s133_s5 = int_to_ptr.hbm [resolvable:$true] %s132_s5 }
  0x2e   : > { %s401_s29 = sshra.s32 %s133_s5, 4  ;;  %s402_s29 = int_to_ptr.hbm [resolvable:$true] %s401_s29 }
  0x2f   : > { %s403_s25 = scalar_lea.hbm %s402_s29, 2  ;;  %p409_p13 = scmp.lt.s32.totalorder %s402_s29, %s742_s2 }
  0x30   : > { %p404_p3 = scmp.ne.s32.totalorder %s402_s29, %s403_s25  ;;  %p410_p2 = scmp.lt.s32.totalorder %s408_s19, %s403_s25 }
  0x32   : > { %p406_p11 = pnand %p405_p9, %p404_p3  ;;  %p411_p5 = por %p410_p2, %p409_p13 }
  0x34   : > { %p407_p12 = pneg %p406_p11 }
  0x36   : > { %p412_p7 = pnand %p411_p5, %p407_p12 }
  0x38   : > { %415 = shalt.err (!%p412_p7)
}
  0x39   : > { %296 = dma.hbm_to_vmem [thread:$0]  (!%p658_p4), %s133_s5, 32, %s135_s30, %s121_s12  }
  0x3a   : > { %143 = sbr.rel (%p669_p8) target bundleno = 80 (0x50), region = 24  ;;  %s145_s15 = sand.u32 (!%p669_p8), 1, %s523_s22  }
  0x3b   : > { %s279_s4 = sshll.u32 (!%p669_p8), %s145_s15, 1  ;;  %s146_s6 = scalar_lea.sflag (!%p669_p8), [#allocation6], %s145_s15 }
  0x3c   : > { %s149_s7 = scalar_lea.vmem (!%p669_p8), [#allocation5], %s279_s4 }
  0x3f   : > { %498 = dma.done.wait (%p631_p6), %s146_s6, 32  }
  0x40   : > { %500 = vsyncadd (%p631_p6), %s146_s6, 4294967264  ;;  %s166_s25 = sand.u32 1, %s511_s0   ;;  %s282_s29 = sshll.u32 %s531_s24, 1  ;;  %v171_v0 = vld [vmem:[%s149_s7] sm:$0x3] }
  0x41   : > { %s170_s16 = sld [smem:[#allocation3 + %s531_s24]]  ;;  %s280_s30 = sshll.u32 %s166_s25, 1 }
  0x42   : > { %s187_s5 = scalar_lea.hbm %s743_s3, %s282_s29  ;;  %s168_s12 = scalar_lea.vmem [#allocation8], %s280_s30 }
  0x43   : > { %s189_s18 = sshll.u32 %s168_s12, 4  ;;  %s191_s17 = sshll.u32 %s187_s5, 4  ;;  %s190_s18 = int_to_ptr.vmem [resolvable:$true] %s189_s18  ;;  %s192_s17 = int_to_ptr.hbm [resolvable:$true] %s191_s17 }
  0x44   : > { %s176_s9 = scalar_lea.sflag [#allocation7], %s166_s25  ;;  %s445_s19 = sshra.s32 %s192_s17, 4  ;;  %s446_s19 = int_to_ptr.hbm [resolvable:$true] %s445_s19 }
  0x45   : > { %s447_s1 = scalar_lea.hbm %s446_s19, 2  ;;  %s451_s15 = scalar_lea.hbm %s743_s3, 4 }
  0x46   : > { %p448_p6 = scmp.ne.s32.totalorder %s446_s19, %s447_s1  ;;  %p452_p3 = scmp.lt.s32.totalorder %s446_s19, %s743_s3 }
  0x47   : > { %v172_v1 = vstv %s170_s16  ;;  %p453_p9 = scmp.lt.s32.totalorder %s451_s15, %s447_s1 }
  0x48   : > { %v173_v2 = vmul.f32 %v172_v1, %v171_v0  ;;  %p449_p4 = pnand %p448_p6, %p640_p10 }
  0x49   : > { %p454_p11 = por %p453_p9, %p452_p3 }
  0x4a   : > { %174 = vst [vmem:[%s168_s12] sm:$0x3] %v173_v2  ;;  %p450_p8 = pneg %p449_p4 }
  0x4c   : > { %p455_p12 = pnand %p454_p11, %p450_p8 }
  0x4e   : > { %458 = shalt.err (!%p455_p12)
}
  0x4f   : > { %289 = dma.vmem_to_hbm [thread:$0]  (%p640_p10), %s190_s18, 32, %s192_s17, %s176_s9  }
  0x50 PF: > { %s203_s7 = sand.u32 1, %s507_s20   ;;  %p298_p13 = pnand %p275_p0, %p647_p1 }
  0x51   : > { %s204_s25 = scalar_lea.sflag [#allocation7], %s203_s7 }
  0x52   : > { %p299_p2 = pneg %p298_p13 }
  0x54   : > { %502 = dma.done.wait (%p299_p2), %s204_s25, 32  }
  0x55   : > { %504 = vsyncadd (%p299_p2), %s204_s25, 4294967264  ;;  %s32_s26 = sadd.s32 1, %s539_s26   ;;  %s755_s24 = sld [smem:[#allocation14_spill]] }
  0x56   : > { %p29_p5 = scmp.ge.s32.totalorder %s32_s26, 4   ;;  %s756_s25 = sld [smem:[#allocation15_spill]] }
  0x57   : > { %s757_s20 = smov %s511_s0  ;;  %s758_s0 = smov %s515_s21 }
  0x58   : > { %s759_s21 = smov %s638_s10  ;;  %s760_s1 = smov %s523_s22 }
  0x59   : > { %s761_s22 = smov %s527_s23  ;;  %s762_s23 = smov %s653_s14 }
  0x5a   :  { %31 = sbr.rel (!%p29_p5) target bundleno = 15 (0xf), region = 69 }
  0x5f   :  { %210 = vsyncpa [#allocation6], 1 }
  0x60   :  { %212 = vsyncpa [#allocation6 + $0x1], 1 }
  0x61   :  { %213 = vsyncpa [#allocation7], 1 }
  0x62   :  { %215 = vsyncpa [#allocation7 + $0x1], 1 }

</bundles_post_ra>
